<compile_context>
chip_gen: v5e
topology: v5e:2x2
jax: 0.10.0
libtpu: 0.0.40
codegen_flags: <defaults>
</compile_context>

<pallas_src>
import jax
import jax.numpy as jnp
from jax.experimental import pallas as pl
from jax.experimental.pallas import tpu as pltpu


HEAD_OUT = 128  # lane-dense fused-head output width (>= action_space + 1)


def _round_up(n, m):
    return ((n + m - 1) // m) * m


def actor_critic2_kernel(x_ref,
                         w1_ref, b1_ref,
                         w2_ref, b2_ref,
                         w3_ref, b3_ref,
                         wh_ref, bh_ref,
                         out_ref):
    # fc1 + ReLU
    h = jnp.dot(x_ref[...], w1_ref[...],
                preferred_element_type=jnp.float32) + b1_ref[...]
    h = jnp.maximum(h, 0.0)

    # fc2 + ReLU
    h = jnp.dot(h, w2_ref[...],
                preferred_element_type=jnp.float32) + b2_ref[...]
    h = jnp.maximum(h, 0.0)

    # fc3 + ReLU
    h = jnp.dot(h, w3_ref[...],
                preferred_element_type=jnp.float32) + b3_ref[...]
    h = jnp.maximum(h, 0.0)

    # fused actor|critic head -> single lane-dense [TILE_B, 128] store
    out_ref[...] = jnp.dot(h, wh_ref[...],
                           preferred_element_type=jnp.float32) + bh_ref[...]


def actor_critic2_forward(x, params):
    """x: [B, input_dim] float32.  params: dict of weights/biases.

    Returns (policy [B, action_space], value [B, 1]).
    """
    B, input_dim = x.shape
    A = params["wa"].shape[1]
    assert A + 1 <= HEAD_OUT, "action_space too large for fused head width"

    # ---- pack params: pad input features to a 128-lane multiple ------------
    f_pad = _round_up(input_dim, 128)
    w1 = params["w1"]
    if f_pad != input_dim:
        w1 = jnp.pad(w1, ((0, f_pad - input_dim), (0, 0)))
        x = jnp.pad(x, ((0, 0), (0, f_pad - input_dim)))

    # ---- fuse actor + critic heads into one lane-dense [128, 128] matmul ---
    wh = jnp.concatenate([params["wa"], params["wc"]], axis=1)   # [128, A+1]
    bh = jnp.concatenate([params["ba"], params["bc"]], axis=1)   # [1,   A+1]
    wh = jnp.pad(wh, ((0, 0), (0, HEAD_OUT - (A + 1))))
    bh = jnp.pad(bh, ((0, 0), (0, HEAD_OUT - (A + 1))))

    # ---- batch tiling -------------------------------------------------------
    tile_b = 128 if B >= 128 else _round_up(B, 8)
    b_pad = _round_up(B, tile_b)
    if b_pad != B:
        x = jnp.pad(x, ((0, b_pad - B), (0, 0)))
    grid = (b_pad // tile_b,)

    def full(shape):
        # constant block index -> weight stays resident in VMEM across grid
        return pl.BlockSpec(shape, lambda i: (0, 0))

    in_specs = [
        pl.BlockSpec((tile_b, f_pad), lambda i: (i, 0)),   # x tile per grid step
        full(w1.shape), full(params["b1"].shape),
        full(params["w2"].shape), full(params["b2"].shape),
        full(params["w3"].shape), full(params["b3"].shape),
        full(wh.shape), full(bh.shape),
    ]
    out_spec = pl.BlockSpec((tile_b, HEAD_OUT), lambda i: (i, 0))

    args = (x, w1, params["b1"], params["w2"], params["b2"],
            params["w3"], params["b3"], wh, bh)

    flops = 2 * b_pad * (f_pad * 256 + 256 * 256 + 256 * 128 + 128 * HEAD_OUT)
    bytes_accessed = 4 * (sum(int(a.size) for a in args) + b_pad * HEAD_OUT)
    cost = pl.CostEstimate(flops=flops, transcendentals=0,
                           bytes_accessed=bytes_accessed)

    out = pl.pallas_call(
        actor_critic2_kernel,
        grid=grid,
        in_specs=in_specs,
        out_specs=out_spec,
        out_shape=jax.ShapeDtypeStruct((b_pad, HEAD_OUT), jnp.float32),
        compiler_params=pltpu.CompilerParams(
            dimension_semantics=("parallel",)),
        cost_estimate=cost,
    )(*args)

    policy = out[:B, :A]
    value = out[:B, A:A + 1]
    return policy, value


def init_params(key, input_dim, action_space):
    """Deterministic synthetic init (PyTorch-style uniform fan-in bounds)."""
    def linear(key, fan_in, fan_out):
        kw, kb = jax.random.split(key)
        bound = 1.0 / (fan_in ** 0.5)
        # stored as [in, out] so the kernel does x @ W
        w = jax.random.uniform(kw, (fan_in, fan_out), jnp.float32, -bound, bound)
        b = jax.random.uniform(kb, (1, fan_out), jnp.float32, -bound, bound)
        return w, b

    k1, k2, k3, ka, kc = jax.random.split(key, 5)
    w1, b1 = linear(k1, input_dim, 256)
    w2, b2 = linear(k2, 256, 256)
    w3, b3 = linear(k3, 256, 128)
    wa, ba = linear(ka, 128, action_space)
    wc, bc = linear(kc, 128, 1)
    return dict(w1=w1, b1=b1, w2=w2, b2=b2, w3=w3, b3=b3,
                wa=wa, ba=ba, wc=wc, bc=bc)


def reference_forward(x, p):
    h = jnp.maximum(x @ p["w1"] + p["b1"], 0.0)
    h = jnp.maximum(h @ p["w2"] + p["b2"], 0.0)
    h = jnp.maximum(h @ p["w3"] + p["b3"], 0.0)
    return h @ p["wa"] + p["ba"], h @ p["wc"] + p["bc"]


if __name__ == "__main__":
    key = jax.random.PRNGKey(0)
    k_x, k_p = jax.random.split(key)

    B, input_dim, action_space = 8, 32, 8
    x = jax.random.normal(k_x, (B, input_dim), jnp.float32)
    params = init_params(k_p, input_dim, action_space)

    policy, value = actor_critic2_forward(x, params)
    policy = jax.block_until_ready(policy)
    value = jax.block_until_ready(value)

    ref_policy, ref_value = reference_forward(x, params)
    assert policy.shape == (B, action_space)
    assert value.shape == (B, 1)
    assert jnp.allclose(policy, ref_policy, atol=1e-4, rtol=1e-4)
    assert jnp.allclose(value, ref_value, atol=1e-4, rtol=1e-4)

    print("KERNEL_OK")
</pallas_src>

<mosaic_0001>
module attributes {stable_mosaic.version = 11 : i64} {
  func.func @actor_critic2_kernel(%arg0: i32, %arg1: memref<8x128xf32, #tpu.memory_space<vmem>>, %arg2: memref<128x256xf32, #tpu.memory_space<vmem>>, %arg3: memref<1x256xf32, #tpu.memory_space<vmem>>, %arg4: memref<256x256xf32, #tpu.memory_space<vmem>>, %arg5: memref<1x256xf32, #tpu.memory_space<vmem>>, %arg6: memref<256x128xf32, #tpu.memory_space<vmem>>, %arg7: memref<1x128xf32, #tpu.memory_space<vmem>>, %arg8: memref<128x128xf32, #tpu.memory_space<vmem>>, %arg9: memref<1x128xf32, #tpu.memory_space<vmem>>, %arg10: memref<8x128xf32, #tpu.memory_space<vmem>>) attributes {dimension_semantics = [#tpu.dimension_semantics<parallel>], iteration_bounds = array<i64: 1>, scalar_prefetch = 0 : i64, scratch_operands = 0 : i64, tpu.core_type = #tpu.core_type<tc>, window_params = [{transform_indices = @transform_0, window_bounds = array<i64: 8, 128>}, {pipeline_mode = #tpu.pipeline_mode<synchronous>, transform_indices = @transform_1, window_bounds = array<i64: 128, 256>}, {pipeline_mode = #tpu.pipeline_mode<synchronous>, transform_indices = @transform_2, window_bounds = array<i64: 1, 256>}, {pipeline_mode = #tpu.pipeline_mode<synchronous>, transform_indices = @transform_3, window_bounds = array<i64: 256, 256>}, {pipeline_mode = #tpu.pipeline_mode<synchronous>, transform_indices = @transform_4, window_bounds = array<i64: 1, 256>}, {pipeline_mode = #tpu.pipeline_mode<synchronous>, transform_indices = @transform_5, window_bounds = array<i64: 256, 128>}, {pipeline_mode = #tpu.pipeline_mode<synchronous>, transform_indices = @transform_6, window_bounds = array<i64: 1, 128>}, {pipeline_mode = #tpu.pipeline_mode<synchronous>, transform_indices = @transform_7, window_bounds = array<i64: 128, 128>}, {pipeline_mode = #tpu.pipeline_mode<synchronous>, transform_indices = @transform_8, window_bounds = array<i64: 1, 128>}, {transform_indices = @transform_9, window_bounds = array<i64: 8, 128>}]} {
    %c0 = arith.constant 0 : index
    %c0_0 = arith.constant 0 : index
    %0 = vector.load %arg1[%c0, %c0_0] : memref<8x128xf32, #tpu.memory_space<vmem>>, vector<8x128xf32>
    %c0_1 = arith.constant 0 : index
    %c0_2 = arith.constant 0 : index
    %1 = vector.load %arg2[%c0_1, %c0_2] : memref<128x256xf32, #tpu.memory_space<vmem>>, vector<128x256xf32>
    %cst = arith.constant dense<0.000000e+00> : vector<8x256xf32>
    %2 = tpu.matmul %0, %1, %cst {dimension_numbers = #tpu.dot_dimension_numbers<[1], [0], [0], [1], [0, 0, 1, 1], [], []>} : vector<8x128xf32>, vector<128x256xf32>, vector<8x256xf32> -> vector<8x256xf32>
    %c0_3 = arith.constant 0 : index
    %c0_4 = arith.constant 0 : index
    %3 = vector.load %arg3[%c0_3, %c0_4] : memref<1x256xf32, #tpu.memory_space<vmem>>, vector<1x256xf32>
    %4 = vector.broadcast %3 : vector<1x256xf32> to vector<8x256xf32>
    %5 = arith.addf %2, %4 : vector<8x256xf32>
    %cst_5 = arith.constant 0.000000e+00 : f32
    %6 = vector.broadcast %cst_5 : f32 to vector<8x256xf32>
    %7 = arith.maximumf %5, %6 : vector<8x256xf32>
    %c0_6 = arith.constant 0 : index
    %c0_7 = arith.constant 0 : index
    %8 = vector.load %arg4[%c0_6, %c0_7] : memref<256x256xf32, #tpu.memory_space<vmem>>, vector<256x256xf32>
    %cst_8 = arith.constant dense<0.000000e+00> : vector<8x256xf32>
    %9 = tpu.matmul %7, %8, %cst_8 {dimension_numbers = #tpu.dot_dimension_numbers<[1], [0], [0], [1], [0, 0, 1, 1], [], []>} : vector<8x256xf32>, vector<256x256xf32>, vector<8x256xf32> -> vector<8x256xf32>
    %c0_9 = arith.constant 0 : index
    %c0_10 = arith.constant 0 : index
    %10 = vector.load %arg5[%c0_9, %c0_10] : memref<1x256xf32, #tpu.memory_space<vmem>>, vector<1x256xf32>
    %11 = vector.broadcast %10 : vector<1x256xf32> to vector<8x256xf32>
    %12 = arith.addf %9, %11 : vector<8x256xf32>
    %cst_11 = arith.constant 0.000000e+00 : f32
    %13 = vector.broadcast %cst_11 : f32 to vector<8x256xf32>
    %14 = arith.maximumf %12, %13 : vector<8x256xf32>
    %c0_12 = arith.constant 0 : index
    %c0_13 = arith.constant 0 : index
    %15 = vector.load %arg6[%c0_12, %c0_13] : memref<256x128xf32, #tpu.memory_space<vmem>>, vector<256x128xf32>
    %cst_14 = arith.constant dense<0.000000e+00> : vector<8x128xf32>
    %16 = tpu.matmul %14, %15, %cst_14 {dimension_numbers = #tpu.dot_dimension_numbers<[1], [0], [0], [1], [0, 0, 1, 1], [], []>} : vector<8x256xf32>, vector<256x128xf32>, vector<8x128xf32> -> vector<8x128xf32>
    %c0_15 = arith.constant 0 : index
    %c0_16 = arith.constant 0 : index
    %17 = vector.load %arg7[%c0_15, %c0_16] : memref<1x128xf32, #tpu.memory_space<vmem>>, vector<1x128xf32>
    %18 = vector.broadcast %17 : vector<1x128xf32> to vector<8x128xf32>
    %19 = arith.addf %16, %18 : vector<8x128xf32>
    %cst_17 = arith.constant 0.000000e+00 : f32
    %20 = vector.broadcast %cst_17 : f32 to vector<8x128xf32>
    %21 = arith.maximumf %19, %20 : vector<8x128xf32>
    %c0_18 = arith.constant 0 : index
    %c0_19 = arith.constant 0 : index
    %22 = vector.load %arg8[%c0_18, %c0_19] : memref<128x128xf32, #tpu.memory_space<vmem>>, vector<128x128xf32>
    %cst_20 = arith.constant dense<0.000000e+00> : vector<8x128xf32>
    %23 = tpu.matmul %21, %22, %cst_20 {dimension_numbers = #tpu.dot_dimension_numbers<[1], [0], [0], [1], [0, 0, 1, 1], [], []>} : vector<8x128xf32>, vector<128x128xf32>, vector<8x128xf32> -> vector<8x128xf32>
    %c0_21 = arith.constant 0 : index
    %c0_22 = arith.constant 0 : index
    %24 = vector.load %arg9[%c0_21, %c0_22] : memref<1x128xf32, #tpu.memory_space<vmem>>, vector<1x128xf32>
    %25 = vector.broadcast %24 : vector<1x128xf32> to vector<8x128xf32>
    %26 = arith.addf %23, %25 : vector<8x128xf32>
    %c0_23 = arith.constant 0 : index
    %c0_24 = arith.constant 0 : index
    %27 = vector.load %arg10[%c0_23, %c0_24] : memref<8x128xf32, #tpu.memory_space<vmem>>, vector<8x128xf32>
    tpu.vector_store %arg10[%c0_23, %c0_24], %26 {strides = array<i32>} : memref<8x128xf32, #tpu.memory_space<vmem>>, vector<8x128xf32>,
    return
  }
  func.func @transform_0(%arg0: i32) -> (i32, i32) {
    %c0_i32 = arith.constant 0 : i32
    %c0_i32_0 = arith.constant 0 : i32
    return %arg0, %c0_i32 : i32, i32
  }
  func.func @transform_1(%arg0: i32) -> (i32, i32) {
    %c0_i32 = arith.constant 0 : i32
    %c0_i32_0 = arith.constant 0 : i32
    %c0_i32_1 = arith.constant 0 : i32
    return %c0_i32, %c0_i32_0 : i32, i32
  }
  func.func @transform_2(%arg0: i32) -> (i32, i32) {
    %c0_i32 = arith.constant 0 : i32
    %c0_i32_0 = arith.constant 0 : i32
    %c0_i32_1 = arith.constant 0 : i32
    return %c0_i32, %c0_i32_0 : i32, i32
  }
  func.func @transform_3(%arg0: i32) -> (i32, i32) {
    %c0_i32 = arith.constant 0 : i32
    %c0_i32_0 = arith.constant 0 : i32
    %c0_i32_1 = arith.constant 0 : i32
    return %c0_i32, %c0_i32_0 : i32, i32
  }
  func.func @transform_4(%arg0: i32) -> (i32, i32) {
    %c0_i32 = arith.constant 0 : i32
    %c0_i32_0 = arith.constant 0 : i32
    %c0_i32_1 = arith.constant 0 : i32
    return %c0_i32, %c0_i32_0 : i32, i32
  }
  func.func @transform_5(%arg0: i32) -> (i32, i32) {
    %c0_i32 = arith.constant 0 : i32
    %c0_i32_0 = arith.constant 0 : i32
    %c0_i32_1 = arith.constant 0 : i32
    return %c0_i32, %c0_i32_0 : i32, i32
  }
  func.func @transform_6(%arg0: i32) -> (i32, i32) {
    %c0_i32 = arith.constant 0 : i32
    %c0_i32_0 = arith.constant 0 : i32
    %c0_i32_1 = arith.constant 0 : i32
    return %c0_i32, %c0_i32_0 : i32, i32
  }
  func.func @transform_7(%arg0: i32) -> (i32, i32) {
    %c0_i32 = arith.constant 0 : i32
    %c0_i32_0 = arith.constant 0 : i32
    %c0_i32_1 = arith.constant 0 : i32
    return %c0_i32, %c0_i32_0 : i32, i32
  }
  func.func @transform_8(%arg0: i32) -> (i32, i32) {
    %c0_i32 = arith.constant 0 : i32
    %c0_i32_0 = arith.constant 0 : i32
    %c0_i32_1 = arith.constant 0 : i32
    return %c0_i32, %c0_i32_0 : i32, i32
  }
  func.func @transform_9(%arg0: i32) -> (i32, i32) {
    %c0_i32 = arith.constant 0 : i32
    %c0_i32_0 = arith.constant 0 : i32
    return %arg0, %c0_i32 : i32, i32
  }
}

</mosaic_0001>

<bundles_post_ra>
// kernel: tpu_custom_call.1
= control target key start
LH: loop header
LB: loop body
LE: loop exit
PB: predicated region body
PF: predicated region fallthrough
CT: control target
= control target key end

     0   :  { %14 = vsyncpa [#allocation3], 0  ;;  %s776_s0 = inlined_call_operand.hbm [shape: f32[8,128], index: 0, kind: input, shape index: {}]   ;;  %s777_s1 = inlined_call_operand.hbm [shape: f32[128,256], index: 1, kind: input, shape index: {}]   ;;  %s778_s2 = inlined_call_operand.hbm [shape: f32[1,256], index: 2, kind: input, shape index: {}]   ;;  %s779_s3 = inlined_call_operand.hbm [shape: f32[256,256], index: 3, kind: input, shape index: {}]   ;;  %s780_s4 = inlined_call_operand.vmem [shape: f32[1,256], index: 4, kind: input, shape index: {}]   ;;  %s781_s5 = inlined_call_operand.hbm [shape: f32[256,128], index: 5, kind: input, shape index: {}]   ;;  %s782_s6 = inlined_call_operand.vmem [shape: f32[1,128], index: 6, kind: input, shape index: {}]   ;;  %s783_s7 = inlined_call_operand.hbm [shape: f32[128,128], index: 7, kind: input, shape index: {}]   ;;  %s784_s8 = inlined_call_operand.vmem [shape: f32[1,128], index: 8, kind: input, shape index: {}]   ;;  %s785_s9 = inlined_call_operand.hbm [shape: f32[8,128], index: 9, kind: output, shape index: {}]  }
   0x1   :  { %15 = vsyncpa [#allocation6], 0 }
   0x2   :  { %16 = vsyncpa [#allocation9], 0 }
   0x3   :  { %17 = vsyncpa [#allocation12], 0  ;;  %s34_s11 = sshll.u32 %s777_s1, 4  ;;  %s35_s11 = int_to_ptr.hbm [resolvable:$true] %s34_s11 }
   0x4   :  { %18 = vsyncpa [#allocation4], 0  ;;  %s685_s12 = smov [#allocation5]   ;;  %s58_s16 = sshll.u32 %s779_s3, 4  ;;  %s59_s16 = int_to_ptr.hbm [resolvable:$true] %s58_s16 }
   0x5   :  { %s36_s13 = sshll.u32 %s685_s12, 4  ;;  %s686_s17 = smov 256   ;;  %s37_s13 = int_to_ptr.vmem [resolvable:$true] %s36_s13 }
   0x6   :  { %s687_s18 = smov 16   ;;  %s688_s19 = smov [#allocation8]  }
   0x7   :  { %42 = dma.hbm_to_vmem [thread:$0]  %s35_s11, 4096, %s37_s13, [#allocation6], %s686_s17, %s686_s17, %s687_s18  }
   0x8   :  { %s60_s20 = sshll.u32 %s688_s19, 4  ;;  %s24_s23 = sshll.u32 %s776_s0, 4  ;;  %s61_s20 = int_to_ptr.vmem [resolvable:$true] %s60_s20  ;;  %s25_s23 = int_to_ptr.hbm [resolvable:$true] %s24_s23 }
   0x9   :  { %66 = dma.hbm_to_vmem [thread:$0]  %s59_s16, 8192, %s61_s20, [#allocation9], %s686_s17, %s686_s17, %s687_s18  }
   0xa   :  { %s48_s25 = sshll.u32 %s778_s2, 4  ;;  %s689_s26 = smov [#allocation2]   ;;  %s49_s25 = int_to_ptr.hbm [resolvable:$true] %s48_s25 }
   0xb   :  { %s26_s27 = sshll.u32 %s689_s26, 4  ;;  %s690_s3 = smov [#allocation7]   ;;  %s27_s27 = int_to_ptr.vmem [resolvable:$true] %s26_s27 }
   0xc   :  { %29 = dma.hbm_to_vmem [thread:$0]  %s25_s23, 128, %s27_s27, [#allocation3]  }
   0xd   :  { %s50_s28 = sshll.u32 %s690_s3, 4  ;;  %s73_s10 = sshll.u32 %s781_s5, 4  ;;  %s51_s28 = int_to_ptr.vmem [resolvable:$true] %s50_s28  ;;  %s74_s10 = int_to_ptr.hbm [resolvable:$true] %s73_s10 }
   0xe   :  { %53 = dma.hbm_to_vmem [thread:$0]  %s49_s25, 32, %s51_s28, [#allocation6]  }
   0xf   :  { %s691_s0 = smov [#allocation10]   ;;  %s88_s2 = sshll.u32 %s783_s7, 4  ;;  %s89_s2 = int_to_ptr.hbm [resolvable:$true] %s88_s2 }
  0x10   :  { %s75_s11 = sshll.u32 %s691_s0, 4  ;;  %s692_s14 = smov 128   ;;  %s76_s11 = int_to_ptr.vmem [resolvable:$true] %s75_s11 }
  0x11   :  { %s693_s15 = smov 8   ;;  %s694_s16 = smov [#allocation11]  }
  0x12   :  { %81 = dma.hbm_to_vmem [thread:$0]  %s74_s10, 4096, %s76_s11, [#allocation9], %s692_s14, %s692_s14, %s693_s15  }
  0x13   :  { %s90_s17 = sshll.u32 %s694_s16, 4  ;;  %s91_s17 = int_to_ptr.vmem [resolvable:$true] %s90_s17 }
  0x14   :  { %96 = dma.hbm_to_vmem [thread:$0]  %s89_s2, 2048, %s91_s17, [#allocation12], %s692_s14, %s692_s14, %s693_s15  }
  0x15   :  { %675 = dma.done.wait [#allocation3], 128  }
  0x16   :  { %676 = vsyncadd [#allocation3], 4294967168 }
  0x17   :  { %677 = dma.done.wait [#allocation6], 4128  }
  0x18   :  { %678 = vsyncadd [#allocation6], 4294963168 }
  0x19   :  { %679 = dma.done.wait [#allocation9], 12288  }
  0x1a   :  { %680 = vsyncadd [#allocation9], 4294955008 }
  0x1b   :  { %681 = dma.done.wait [#allocation12], 2048  }
  0x1c   :  { %682 = vsyncadd [#allocation12], 4294965248  ;;  %v154_v0 = vld [vmem:[#allocation5 + $0xf0] sm:$0xff]  ;;  %v152_v1 = vld [vmem:[#allocation5 + $0xe0] sm:$0xff]  ;;  %s695_s21 = smov [#allocation13]   ;;  %s481_s24 = sshll.u32 %s785_s9, 4  ;;  %s482_s24 = int_to_ptr.hbm [resolvable:$true] %s481_s24 }
  0x1d   :  { %v155_v2 = vld [vmem:[#allocation5 + $0xf8] sm:$0xff]  ;;  %162 = vmatpush.msra.mxu0 %v154_v0  ;;  %v153_v3 = vld [vmem:[#allocation5 + $0xe8] sm:$0xff]  ;;  %v150_v4 = vld [vmem:[#allocation5 + $0xd0] sm:$0xff]  ;;  %s479_s22 = sshll.u32 %s695_s21, 4  ;;  %s480_s22 = int_to_ptr.vmem [resolvable:$true] %s479_s22 }
  0x1e   :  { %182 = vmatpush.msra.mxu1 %v155_v2  ;;  %v151_v5 = vld [vmem:[#allocation5 + $0xd8] sm:$0xff]  ;;  %v148_v6 = vld [vmem:[#allocation5 + $0xc0] sm:$0xff]  ;;  %v149_v7 = vld [vmem:[#allocation5 + $0xc8] sm:$0xff] }
  0x1f   :  { %163 = vmatpush.msra.mxu0 %v152_v1  ;;  %v146_v8 = vld [vmem:[#allocation5 + $0xb0] sm:$0xff]  ;;  %v147_v9 = vld [vmem:[#allocation5 + $0xb8] sm:$0xff]  ;;  %v144_v10 = vld [vmem:[#allocation5 + $0xa0] sm:$0xff] }
  0x20   :  { %183 = vmatpush.msra.mxu1 %v153_v3  ;;  %v145_v11 = vld [vmem:[#allocation5 + $0xa8] sm:$0xff]  ;;  %v142_v12 = vld [vmem:[#allocation5 + $0x90] sm:$0xff]  ;;  %v143_v13 = vld [vmem:[#allocation5 + $0x98] sm:$0xff] }
  0x21   :  { %164 = vmatpush.msra.mxu0 %v150_v4  ;;  %v234_v14 = vld [vmem:[#allocation8 + $0xf0] sm:$0xff]  ;;  %v232_v15 = vld [vmem:[#allocation8 + $0xe0] sm:$0xff]  ;;  %v235_v52 = vld [vmem:[#allocation8 + $0xf8] sm:$0xff] }
  0x22   :  { %184 = vmatpush.msra.mxu1 %v151_v5  ;;  %v140_v16 = vld [vmem:[#allocation5 + $0x80] sm:$0xff]  ;;  %v141_v17 = vld [vmem:[#allocation5 + $0x88] sm:$0xff]  ;;  %274 = vmatpush.msra.mxu2 %v234_v14  ;;  %v266_v18 = vld [vmem:[#allocation8 + $0x1f0] sm:$0xff] }
  0x23   :  { %165 = vmatpush.msra.mxu0 %v148_v6  ;;  %v230_v19 = vld [vmem:[#allocation8 + $0xd0] sm:$0xff]  ;;  %v264_v20 = vld [vmem:[#allocation8 + $0x1e0] sm:$0xff]  ;;  %294 = vmatpush.msra.mxu3 %v266_v18  ;;  %v267_v53 = vld [vmem:[#allocation8 + $0x1f8] sm:$0xff] }
  0x24   :  { %185 = vmatpush.msra.mxu1 %v149_v7  ;;  %v138_v21 = vld [vmem:[#allocation5 + $0x70] sm:$0xff]  ;;  %v139_v22 = vld [vmem:[#allocation5 + $0x78] sm:$0xff]  ;;  %275 = vmatpush.msra.mxu2 %v232_v15  ;;  %v228_v23 = vld [vmem:[#allocation8 + $0xc0] sm:$0xff] }
  0x25   :  { %166 = vmatpush.msra.mxu0 %v146_v8  ;;  %v262_v24 = vld [vmem:[#allocation8 + $0x1d0] sm:$0xff]  ;;  %v136_v25 = vld [vmem:[#allocation5 + $0x60] sm:$0xff]  ;;  %v137_v26 = vld [vmem:[#allocation5 + $0x68] sm:$0xff]  ;;  %295 = vmatpush.msra.mxu3 %v264_v20 }
  0x26   :  { %186 = vmatpush.msra.mxu1 %v147_v9  ;;  %276 = vmatpush.msra.mxu2 %v230_v19  ;;  %v226_v27 = vld [vmem:[#allocation8 + $0xb0] sm:$0xff]  ;;  %v260_v28 = vld [vmem:[#allocation8 + $0x1c0] sm:$0xff]  ;;  %v233_v56 = vld [vmem:[#allocation8 + $0xe8] sm:$0xff] }
  0x27   :  { %167 = vmatpush.msra.mxu0 %v144_v10  ;;  %v134_v29 = vld [vmem:[#allocation5 + $0x50] sm:$0xff]  ;;  %v135_v30 = vld [vmem:[#allocation5 + $0x58] sm:$0xff]  ;;  %296 = vmatpush.msra.mxu3 %v262_v24  ;;  %v224_v31 = vld [vmem:[#allocation8 + $0xa0] sm:$0xff] }
  0x28   :  { %187 = vmatpush.msra.mxu1 %v145_v11  ;;  %277 = vmatpush.msra.mxu2 %v228_v23  ;;  %v258_v32 = vld [vmem:[#allocation8 + $0x1b0] sm:$0xff]  ;;  %v132_v33 = vld [vmem:[#allocation5 + $0x40] sm:$0xff]  ;;  %v133_v34 = vld [vmem:[#allocation5 + $0x48] sm:$0xff] }
  0x29   :  { %168 = vmatpush.msra.mxu0 %v142_v12  ;;  %297 = vmatpush.msra.mxu3 %v260_v28  ;;  %v222_v35 = vld [vmem:[#allocation8 + $0x90] sm:$0xff]  ;;  %v256_v36 = vld [vmem:[#allocation8 + $0x1a0] sm:$0xff]  ;;  %v265_v57 = vld [vmem:[#allocation8 + $0x1e8] sm:$0xff] }
  0x2a   :  { %188 = vmatpush.msra.mxu1 %v143_v13  ;;  %278 = vmatpush.msra.mxu2 %v226_v27  ;;  %v130_v37 = vld [vmem:[#allocation5 + $0x30] sm:$0xff]  ;;  %v131_v38 = vld [vmem:[#allocation5 + $0x38] sm:$0xff]  ;;  %v220_v39 = vld [vmem:[#allocation8 + $0x80] sm:$0xff] }
  0x2b   :  { %169 = vmatpush.msra.mxu0 %v140_v16  ;;  %298 = vmatpush.msra.mxu3 %v258_v32  ;;  %v254_v40 = vld [vmem:[#allocation8 + $0x190] sm:$0xff]  ;;  %v128_v41 = vld [vmem:[#allocation5 + $0x20] sm:$0xff]  ;;  %v129_v42 = vld [vmem:[#allocation5 + $0x28] sm:$0xff] }
  0x2c   :  { %189 = vmatpush.msra.mxu1 %v141_v17  ;;  %279 = vmatpush.msra.mxu2 %v224_v31  ;;  %v218_v43 = vld [vmem:[#allocation8 + $0x70] sm:$0xff]  ;;  %v252_v44 = vld [vmem:[#allocation8 + $0x180] sm:$0xff]  ;;  %v231_v60 = vld [vmem:[#allocation8 + $0xd8] sm:$0xff] }
  0x2d   :  { %170 = vmatpush.msra.mxu0 %v138_v21  ;;  %299 = vmatpush.msra.mxu3 %v256_v36  ;;  %v126_v45 = vld [vmem:[#allocation5 + $0x10] sm:$0xff]  ;;  %v127_v46 = vld [vmem:[#allocation5 + $0x18] sm:$0xff]  ;;  %v124_v47 = vld [vmem:[#allocation5] sm:$0xff] }
  0x2e   :  { %190 = vmatpush.msra.mxu1 %v139_v22  ;;  %280 = vmatpush.msra.mxu2 %v222_v35  ;;  %v216_v48 = vld [vmem:[#allocation8 + $0x60] sm:$0xff]  ;;  %v250_v49 = vld [vmem:[#allocation8 + $0x170] sm:$0xff]  ;;  %v263_v61 = vld [vmem:[#allocation8 + $0x1d8] sm:$0xff] }
  0x2f   :  { %171 = vmatpush.msra.mxu0 %v136_v25  ;;  %300 = vmatpush.msra.mxu3 %v254_v40  ;;  %v125_v50 = vld [vmem:[#allocation5 + $0x8] sm:$0xff]  ;;  %v123_v51 = vld [vmem:[#allocation2] sm:$0xff] }
  0x30   :  { %191 = vmatpush.msra.mxu1 %v137_v26  ;;  %281 = vmatpush.msra.mxu2 %v220_v39  ;;  %v214_v54 = vld [vmem:[#allocation8 + $0x50] sm:$0xff]  ;;  %v248_v55 = vld [vmem:[#allocation8 + $0x160] sm:$0xff]  ;;  %v229_v0 = vld [vmem:[#allocation8 + $0xc8] sm:$0xff] }
  0x31   :  { %172 = vmatpush.msra.mxu0 %v134_v29  ;;  %301 = vmatpush.msra.mxu3 %v252_v44  ;;  %v212_v58 = vld [vmem:[#allocation8 + $0x40] sm:$0xff]  ;;  %v246_v59 = vld [vmem:[#allocation8 + $0x150] sm:$0xff]  ;;  %v261_v1 = vld [vmem:[#allocation8 + $0x1c8] sm:$0xff] }
  0x32   :  { %192 = vmatpush.msra.mxu1 %v135_v30  ;;  %282 = vmatpush.msra.mxu2 %v218_v43  ;;  %v210_v62 = vld [vmem:[#allocation8 + $0x30] sm:$0xff]  ;;  %v244_v63 = vld [vmem:[#allocation8 + $0x140] sm:$0xff]  ;;  %v227_v2 = vld [vmem:[#allocation8 + $0xb8] sm:$0xff] }
  0x33   :  { %173 = vmatpush.msra.mxu0 %v132_v33  ;;  %302 = vmatpush.msra.mxu3 %v250_v49  ;;  %v259_v3 = vld [vmem:[#allocation8 + $0x1b8] sm:$0xff]  ;;  %v225_v4 = vld [vmem:[#allocation8 + $0xa8] sm:$0xff]  ;;  %v208_v19 = vld [vmem:[#allocation8 + $0x20] sm:$0xff] }
  0x34   :  { %193 = vmatpush.msra.mxu1 %v133_v34  ;;  %283 = vmatpush.msra.mxu2 %v216_v48  ;;  %v257_v5 = vld [vmem:[#allocation8 + $0x1a8] sm:$0xff]  ;;  %v223_v6 = vld [vmem:[#allocation8 + $0x98] sm:$0xff]  ;;  %v242_v20 = vld [vmem:[#allocation8 + $0x130] sm:$0xff] }
  0x35   :  { %174 = vmatpush.msra.mxu0 %v130_v37  ;;  %303 = vmatpush.msra.mxu3 %v248_v55  ;;  %v255_v7 = vld [vmem:[#allocation8 + $0x198] sm:$0xff]  ;;  %v221_v8 = vld [vmem:[#allocation8 + $0x88] sm:$0xff]  ;;  %v206_v23 = vld [vmem:[#allocation8 + $0x10] sm:$0xff] }
  0x36   :  { %194 = vmatpush.msra.mxu1 %v131_v38  ;;  %284 = vmatpush.msra.mxu2 %v214_v54  ;;  %v253_v9 = vld [vmem:[#allocation8 + $0x188] sm:$0xff]  ;;  %v219_v10 = vld [vmem:[#allocation8 + $0x78] sm:$0xff]  ;;  %v240_v24 = vld [vmem:[#allocation8 + $0x120] sm:$0xff] }
  0x37   :  { %175 = vmatpush.msra.mxu0 %v128_v41  ;;  %304 = vmatpush.msra.mxu3 %v246_v59  ;;  %v251_v11 = vld [vmem:[#allocation8 + $0x178] sm:$0xff]  ;;  %v217_v12 = vld [vmem:[#allocation8 + $0x68] sm:$0xff]  ;;  %v204_v27 = vld [vmem:[#allocation8] sm:$0xff] }
  0x38   :  { %195 = vmatpush.msra.mxu1 %v129_v42  ;;  %285 = vmatpush.msra.mxu2 %v212_v58  ;;  %v249_v13 = vld [vmem:[#allocation8 + $0x168] sm:$0xff]  ;;  %v215_v14 = vld [vmem:[#allocation8 + $0x58] sm:$0xff]  ;;  %v238_v28 = vld [vmem:[#allocation8 + $0x110] sm:$0xff] }
  0x39   :  { %176 = vmatpush.msra.mxu0 %v126_v45  ;;  %305 = vmatpush.msra.mxu3 %v244_v63  ;;  %v247_v15 = vld [vmem:[#allocation8 + $0x158] sm:$0xff]  ;;  %v213_v16 = vld [vmem:[#allocation8 + $0x48] sm:$0xff]  ;;  %v236_v31 = vld [vmem:[#allocation8 + $0x100] sm:$0xff] }
  0x3a   :  { %196 = vmatpush.msra.mxu1 %v127_v46  ;;  %286 = vmatpush.msra.mxu2 %v210_v62  ;;  %v245_v17 = vld [vmem:[#allocation8 + $0x148] sm:$0xff]  ;;  %v211_v18 = vld [vmem:[#allocation8 + $0x38] sm:$0xff]  ;;  %v386_v34 = vld [vmem:[#allocation10 + $0xf0] sm:$0xff] }
  0x3b   :  { %177 = vmatpush.msra.mxu0 %v124_v47  ;;  %v209_v21 = vld [vmem:[#allocation8 + $0x28] sm:$0xff]  ;;  %306 = vmatpush.msra.mxu3 %v242_v20  ;;  %v243_v22 = vld [vmem:[#allocation8 + $0x138] sm:$0xff]  ;;  %v370_v36 = vld [vmem:[#allocation10 + $0x70] sm:$0xff] }
  0x3c   :  { %197 = vmatpush.msra.mxu1 %v125_v50  ;;  %178 = vmatmul.f32.vlgmr.msra.gmra.mxu0 %v123_v51  ;;  %v207_v25 = vld [vmem:[#allocation8 + $0x18] sm:$0xff]  ;;  %v241_v26 = vld [vmem:[#allocation8 + $0x128] sm:$0xff]  ;;  %v384_v39 = vld [vmem:[#allocation10 + $0xe0] sm:$0xff] }
  0x3d   :  { %198 = vmatmul.f32.vlgmr.msra.gmra.mxu1 %v123_v51  ;;  %314 = vmatpush.msrb.mxu0 %v235_v52  ;;  %v205_v29 = vld [vmem:[#allocation8 + $0x8] sm:$0xff]  ;;  %v239_v30 = vld [vmem:[#allocation8 + $0x118] sm:$0xff]  ;;  %v368_v40 = vld [vmem:[#allocation10 + $0x60] sm:$0xff] }
  0x3e   :  { %334 = vmatpush.msrb.mxu1 %v267_v53  ;;  %287 = vmatpush.msra.mxu2 %v208_v19  ;;  %v237_v32 = vld [vmem:[#allocation8 + $0x108] sm:$0xff]  ;;  %v387_v33 = vld [vmem:[#allocation10 + $0xf8] sm:$0xff]  ;;  %v382_v43 = vld [vmem:[#allocation10 + $0xd0] sm:$0xff] }
  0x3f   :  { %315 = vmatpush.msrb.mxu0 %v233_v56  ;;  %307 = vmatpush.msra.mxu3 %v240_v24  ;;  %v371_v35 = vld [vmem:[#allocation10 + $0x78] sm:$0xff]  ;;  %v385_v37 = vld [vmem:[#allocation10 + $0xe8] sm:$0xff]  ;;  %v366_v44 = vld [vmem:[#allocation10 + $0x50] sm:$0xff] }
  0x40   :  { %335 = vmatpush.msrb.mxu1 %v265_v57  ;;  %288 = vmatpush.msra.mxu2 %v206_v23  ;;  %v369_v38 = vld [vmem:[#allocation10 + $0x68] sm:$0xff]  ;;  %v383_v41 = vld [vmem:[#allocation10 + $0xd8] sm:$0xff]  ;;  %v380_v47 = vld [vmem:[#allocation10 + $0xc0] sm:$0xff] }
  0x41   :  { %316 = vmatpush.msrb.mxu0 %v231_v60  ;;  %308 = vmatpush.msra.mxu3 %v238_v28  ;;  %v367_v42 = vld [vmem:[#allocation10 + $0x58] sm:$0xff]  ;;  %v381_v45 = vld [vmem:[#allocation10 + $0xc8] sm:$0xff]  ;;  %v364_v48 = vld [vmem:[#allocation10 + $0x40] sm:$0xff] }
  0x42   :  { %336 = vmatpush.msrb.mxu1 %v263_v61  ;;  %289 = vmatpush.msra.mxu2 %v204_v27  ;;  %v365_v46 = vld [vmem:[#allocation10 + $0x48] sm:$0xff]  ;;  %v379_v49 = vld [vmem:[#allocation10 + $0xb8] sm:$0xff]  ;;  %v378_v51 = vld [vmem:[#allocation10 + $0xb0] sm:$0xff] }
  0x43   :  { %317 = vmatpush.msrb.mxu0 %v229_v0  ;;  %309 = vmatpush.msra.mxu3 %v236_v31  ;;  %v363_v50 = vld [vmem:[#allocation10 + $0x38] sm:$0xff]  ;;  %v377_v52 = vld [vmem:[#allocation10 + $0xa8] sm:$0xff]  ;;  %v376_v54 = vld [vmem:[#allocation10 + $0xa0] sm:$0xff] }
  0x44   :  { %337 = vmatpush.msrb.mxu1 %v261_v1  ;;  %392 = vmatpush.msrb.mxu2 %v371_v35  ;;  %v156_v53 = vld [vmem:[#allocation7] sm:$0x3]  ;;  %v362_v63 = vld [vmem:[#allocation10 + $0x30] sm:$0xff]  ;;  %v361_v1 = vld [vmem:[#allocation10 + $0x28] sm:$0xff] }
  0x45   :  { %318 = vmatpush.msrb.mxu0 %v227_v2  ;;  %412 = vmatpush.msrb.mxu3 %v387_v33  ;;  %v158_v55 = vperm.slane %v156_v53, 0  ;;  %v159_v56 = vperm.slane %v156_v53, 1  ;;  %v375_v0 = vld [vmem:[#allocation10 + $0x98] sm:$0xff]  ;;  %v374_v2 = vld [vmem:[#allocation10 + $0x90] sm:$0xff]  ;;  %v438_v33 = vld [vmem:[#allocation11 + $0x28] sm:$0xff] }
  0x46   :  { %338 = vmatpush.msrb.mxu1 %v259_v3  ;;  %393 = vmatpush.msrb.mxu2 %v370_v36  ;;  %v360_v3 = vld [vmem:[#allocation10 + $0x20] sm:$0xff]  ;;  %v440_v19 = vld [vmem:[#allocation11 + $0x38] sm:$0xff]  ;;  %v435_v36 = vld [vmem:[#allocation11 + $0x10] sm:$0xff] }
  0x47   :  { %319 = vmatpush.msrb.mxu0 %v225_v4  ;;  %413 = vmatpush.msrb.mxu3 %v386_v34  ;;  %v373_v4 = vld [vmem:[#allocation10 + $0x88] sm:$0xff]  ;;  %v437_v34 = vld [vmem:[#allocation11 + $0x20] sm:$0xff]  ;;  %v436_v35 = vld [vmem:[#allocation11 + $0x18] sm:$0xff] }
  0x48   :  { %339 = vmatpush.msrb.mxu1 %v257_v5  ;;  %394 = vmatpush.msrb.mxu2 %v369_v38  ;;  %v359_v5 = vld [vmem:[#allocation10 + $0x18] sm:$0xff]  ;;  %v433_v38 = vld [vmem:[#allocation11] sm:$0xff] }
  0x49   :  { %320 = vmatpush.msrb.mxu0 %v223_v6  ;;  %414 = vmatpush.msrb.mxu3 %v385_v37  ;;  %v372_v6 = vld [vmem:[#allocation10 + $0x80] sm:$0xff]  ;;  %v434_v37 = vld [vmem:[#allocation11 + $0x8] sm:$0xff] }
  0x4a   :  { %340 = vmatpush.msrb.mxu1 %v255_v7  ;;  %395 = vmatpush.msrb.mxu2 %v368_v40  ;;  %v358_v7 = vld [vmem:[#allocation10 + $0x10] sm:$0xff] }
  0x4b   :  { %321 = vmatpush.msrb.mxu0 %v221_v8  ;;  %415 = vmatpush.msrb.mxu3 %v384_v39  ;;  %v357_v8 = vld [vmem:[#allocation10 + $0x8] sm:$0xff]  ;;  %v505_v39 = vld [vmem:[%s782_s6] ss:$0 sm:$0xff] }
  0x4c   :  { %341 = vmatpush.msrb.mxu1 %v253_v9  ;;  %396 = vmatpush.msrb.mxu2 %v367_v42  ;;  %v356_v9 = vld [vmem:[#allocation10] sm:$0xff] }
  0x4d   :  { %322 = vmatpush.msrb.mxu0 %v219_v10  ;;  %416 = vmatpush.msrb.mxu3 %v383_v41  ;;  %v448_v10 = vld [vmem:[#allocation11 + $0x78] sm:$0xff] }
  0x4e   :  { %342 = vmatpush.msrb.mxu1 %v251_v11  ;;  %397 = vmatpush.msrb.mxu2 %v366_v44  ;;  %v447_v11 = vld [vmem:[#allocation11 + $0x70] sm:$0xff] }
  0x4f   :  { %323 = vmatpush.msrb.mxu0 %v217_v12  ;;  %417 = vmatpush.msrb.mxu3 %v382_v43  ;;  %v446_v12 = vld [vmem:[#allocation11 + $0x68] sm:$0xff] }
  0x50   :  { %343 = vmatpush.msrb.mxu1 %v249_v13  ;;  %398 = vmatpush.msrb.mxu2 %v365_v46  ;;  %v445_v13 = vld [vmem:[#allocation11 + $0x60] sm:$0xff] }
  0x51   :  { %324 = vmatpush.msrb.mxu0 %v215_v14  ;;  %418 = vmatpush.msrb.mxu3 %v381_v45  ;;  %v444_v14 = vld [vmem:[#allocation11 + $0x58] sm:$0xff]  ;;  %v506_v45 = vld [vmem:[%s784_s8] ss:$0 sm:$0xff] }
  0x52   :  { %344 = vmatpush.msrb.mxu1 %v247_v15  ;;  %399 = vmatpush.msrb.mxu2 %v364_v48  ;;  %v443_v15 = vld [vmem:[#allocation11 + $0x50] sm:$0xff] }
  0x53   :  { %325 = vmatpush.msrb.mxu0 %v213_v16  ;;  %419 = vmatpush.msrb.mxu3 %v380_v47  ;;  %v442_v16 = vld [vmem:[#allocation11 + $0x48] sm:$0xff] }
  0x54   :  { %345 = vmatpush.msrb.mxu1 %v245_v17  ;;  %400 = vmatpush.msrb.mxu2 %v363_v50  ;;  %v441_v17 = vld [vmem:[#allocation11 + $0x40] sm:$0xff] }
  0x55   :  { %326 = vmatpush.msrb.mxu0 %v211_v18  ;;  %420 = vmatpush.msrb.mxu3 %v379_v49  ;;  %v268_v18 = vld [vmem:[%s780_s4] sm:$0x3] }
  0x56   :  { %346 = vmatpush.msrb.mxu1 %v243_v22  ;;  %401 = vmatpush.msrb.mxu2 %v362_v63  ;;  %v271_v20 = vperm.slane %v268_v18, 1 }
  0x57   :  { %327 = vmatpush.msrb.mxu0 %v209_v21  ;;  %421 = vmatpush.msrb.mxu3 %v378_v51 }
  0x58   :  { %347 = vmatpush.msrb.mxu1 %v241_v26  ;;  %402 = vmatpush.msrb.mxu2 %v361_v1 }
  0x59   :  { %328 = vmatpush.msrb.mxu0 %v207_v25  ;;  %422 = vmatpush.msrb.mxu3 %v377_v52  ;;  %v270_v25 = vperm.slane %v268_v18, 0 }
  0x5a   :  { %348 = vmatpush.msrb.mxu1 %v239_v30  ;;  %403 = vmatpush.msrb.mxu2 %v360_v3 }
  0x5b   :  { %329 = vmatpush.msrb.mxu0 %v205_v29  ;;  %423 = vmatpush.msrb.mxu3 %v376_v54 }
  0x5c   :  { %349 = vmatpush.msrb.mxu1 %v237_v32  ;;  %404 = vmatpush.msrb.mxu2 %v359_v5  ;;  %v439_v32 = vld [vmem:[#allocation11 + $0x30] sm:$0xff] }
  0x5d   :  { %424 = vmatpush.msrb.mxu3 %v375_v0  ;;  %453 = vmatpush.msra.mxu0 %v448_v10 }
  0x5e   :  { %405 = vmatpush.msrb.mxu2 %v358_v7 }
  0x5f   :  { %425 = vmatpush.msrb.mxu3 %v374_v2  ;;  %454 = vmatpush.msra.mxu0 %v447_v11 }
  0x60   :  { %406 = vmatpush.msrb.mxu2 %v357_v8 }
  0x61   :  { %426 = vmatpush.msrb.mxu3 %v373_v4  ;;  %455 = vmatpush.msra.mxu0 %v446_v12 }
  0x62   :  { %407 = vmatpush.msrb.mxu2 %v356_v9 }
  0x63   :  { %427 = vmatpush.msrb.mxu3 %v372_v6  ;;  %456 = vmatpush.msra.mxu0 %v445_v13 }
  0x65   :  { %457 = vmatpush.msra.mxu0 %v444_v14 }
  0x67   :  { %458 = vmatpush.msra.mxu0 %v443_v15 }
  0x69   :  { %459 = vmatpush.msra.mxu0 %v442_v16 }
  0x6b   :  { %460 = vmatpush.msra.mxu0 %v441_v17 }
  0x6d   :  { %461 = vmatpush.msra.mxu0 %v440_v19 }
  0x6f   :  { %462 = vmatpush.msra.mxu0 %v439_v32 }
  0x71   :  { %463 = vmatpush.msra.mxu0 %v438_v33 }
  0x73   :  { %464 = vmatpush.msra.mxu0 %v437_v34 }
  0x75   :  { %465 = vmatpush.msra.mxu0 %v436_v35 }
  0x77   :  { %466 = vmatpush.msra.mxu0 %v435_v36 }
  0x79   :  { %467 = vmatpush.msra.mxu0 %v434_v37 }
  0x7b   :  { %468 = vmatpush.msra.mxu0 %v433_v38 }
  0xb9   :  { %v179_v57 = vpop.f32.mrf.mxu0 }
  0xba   :  { %v199_v58 = vpop.f32.mrf.mxu1  ;;  %v180_v59 = vadd.f32 %v179_v57, %v158_v55 }
  0xbb   :  { %v200_v60 = vadd.f32 %v199_v58, %v159_v56 }
  0xbc   :  { %v202_v61 = vmax.f32 %v180_v59, 0.0 }
  0xbd   :  { %v203_v62 = vmax.f32 %v200_v60, 0.0 }
  0xbe   :  { %290 = vmatmul.f32.vlgmr.msra.gmra.mxu2 %v202_v61  ;;  %330 = vmatmul.f32.vlgmr.msrb.gmra.mxu0 %v202_v61 }
  0xbf   :  { %310 = vmatmul.f32.vlgmr.msra.gmra.mxu3 %v203_v62  ;;  %350 = vmatmul.f32.vlgmr.msrb.gmra.mxu1 %v203_v62 }
 0x13b   :  { %v331_v21 = vpop.f32.mrf.mxu0 }
 0x13c   :  { %v332_v22 = vadd.f32 %v331_v21, %v271_v20  ;;  %v351_v23 = vpop.f32.mrf.mxu1 }
 0x13e   :  { %v352_v24 = vadd.f32 %v351_v23, %v332_v22 }
 0x140   :  { %v355_v26 = vmax.f32 %v352_v24, 0.0 }
 0x141   :  { %v291_v27 = vpop.f32.mrf.mxu2 }
 0x142   :  { %v292_v28 = vadd.f32 %v291_v27, %v270_v25  ;;  %428 = vmatmul.f32.vlgmr.msrb.gmra.mxu3 %v355_v26  ;;  %v311_v29 = vpop.f32.mrf.mxu3 }
 0x144   :  { %v312_v30 = vadd.f32 %v311_v29, %v292_v28 }
 0x146   :  { %v354_v31 = vmax.f32 %v312_v30, 0.0 }
 0x148   :  { %408 = vmatmul.f32.vlgmr.msrb.gmra.mxu2 %v354_v31 }
 0x1c5   :  { %v429_v42 = vpop.f32.mrf.mxu3 }
 0x1cb   :  { %v409_v40 = vpop.f32.mrf.mxu2 }
 0x1cc   :  { %v410_v41 = vadd.f32 %v505_v39, %v409_v40 }
 0x1ce   :  { %v430_v43 = vadd.f32 %v429_v42, %v410_v41 }
 0x1d0   :  { %v432_v44 = vmax.f32 %v430_v43, 0.0 }
 0x1d2   :  { %469 = vmatmul.f32.vlgmr.msra.gmra.mxu0 %v432_v44 }
 0x24f   :  { %v470_v46 = vpop.f32.mrf.mxu0 }
 0x250   :  { %v471_v47 = vadd.f32 %v506_v45, %v470_v46 }
 0x252   :  { %473 = vst [vmem:[#allocation13] sm:$0xff] %v471_v47 }
 0x253   :  { %484 = dma.vmem_to_hbm [thread:$0]  %s480_s22, 128, %s482_s24, [#allocation4]  }
 0x254   :  { %683 = dma.done.wait [#allocation4], 128  }
 0x255   :  { %684 = vsyncadd [#allocation4], 4294967168 }
 0x256   :  { %489 = vsyncpa [#allocation3], 1 }
 0x257   :  { %490 = vsyncpa [#allocation6], 1 }
 0x258   :  { %491 = vsyncpa [#allocation9], 1 }
 0x259   :  { %492 = vsyncpa [#allocation12], 1 }
 0x25a   :  { %493 = vsyncpa [#allocation4], 1 }

</bundles_post_ra>
